<compile_context>
chip_gen: v7x
topology: tpu7x:2x2x1
jax: 0.10.0
libtpu: 0.0.40
codegen_flags: <defaults>
</compile_context>

<pallas_src>
import math

import jax
import jax.numpy as jnp
from jax.experimental import pallas as pl
from jax.experimental.pallas import tpu as pltpu


# --------------------------------------------------------------------------
# Kernels
# --------------------------------------------------------------------------
def _gcn_fused_kernel(adj_ref, w1_ref, b1_ref, wout_ref, bout_ref, o_ref):
    """One branch end-to-end: out = adj @ (relu(adj @ W1 + b1) @ Wout) + bout."""
    adj = adj_ref[...]
    h = jnp.dot(adj, w1_ref[...], preferred_element_type=jnp.float32) + b1_ref[...]
    h = jnp.maximum(h, 0.0)
    # TODO(synk): nn.Dropout(p=0.3) is identity in eval mode; training-mode RNG dropout omitted.
    s = jnp.dot(h, wout_ref[...], preferred_element_type=jnp.float32)
    o_ref[...] = jnp.dot(adj, s, preferred_element_type=jnp.float32) + bout_ref[...]


def _gcn_stage1_kernel(adj_ref, w1_ref, b1_ref, wout_ref, s_ref):
    """s_tile = relu(adj_tile @ W1 + b1) @ Wout   (gcn1 + ReLU + first matmul of gcn{2,3})."""
    h = jnp.dot(adj_ref[...], w1_ref[...],
                preferred_element_type=jnp.float32) + b1_ref[...]
    h = jnp.maximum(h, 0.0)
    s_ref[...] = jnp.dot(h, wout_ref[...], preferred_element_type=jnp.float32)


def _gcn_stage2_kernel(adj_ref, s_ref, bout_ref, o_ref):
    """out_tile = adj_tile @ s + bout   (second half of gcn{2,3})."""
    o_ref[...] = jnp.dot(adj_ref[...], s_ref[...],
                         preferred_element_type=jnp.float32) + bout_ref[...]


# --------------------------------------------------------------------------
# Helpers
# --------------------------------------------------------------------------
def _pad_axis(x, axis, multiple):
    pad = (-x.shape[axis]) % multiple
    if pad == 0:
        return x
    widths = [(0, 0)] * x.ndim
    widths[axis] = (0, pad)
    return jnp.pad(x, widths)


def row_normalize(mx):
    """Row-normalize a dense matrix (matches GCN.normalize: 1/rowsum, inf -> 0)."""
    rowsum = mx.sum(axis=1)
    r_inv = jnp.where(rowsum > 0, 1.0 / rowsum, 0.0)
    return mx * r_inv[:, None]


# --------------------------------------------------------------------------
# Forward wrapper
# --------------------------------------------------------------------------
def gcn_forward(ehr_adj_norm, ddi_adj_norm, w1, b1, w2, b2, w3, b3):
    """Pallas TPU implementation of GCN.forward() -> (ehr_node_embedding, ddi_node_embedding)."""
    f32 = jnp.float32
    v = ehr_adj_norm.shape[0]
    e = w1.shape[1]

    # Zero-pad: vocab dim -> multiple of 8 (sublane), embedding dim -> multiple
    # of 128 (lane-dense stores).  Zero rows/cols keep the math exact.
    adj = jnp.stack([ehr_adj_norm, ddi_adj_norm]).astype(f32)            # [2, V, V]
    adj = _pad_axis(_pad_axis(adj, 1, 8), 2, 8)                          # [2, Vp, Vp]
    w1p = _pad_axis(_pad_axis(w1.astype(f32), 0, 8), 1, 128)             # [Vp, Ep]
    b1p = _pad_axis(b1.reshape(1, e).astype(f32), 1, 128)                # [1, Ep]
    w_out = _pad_axis(_pad_axis(jnp.stack([w2, w3]).astype(f32), 1, 128), 2, 128)  # [2, Ep, Ep]
    b_out = _pad_axis(jnp.stack([b2, b3]).reshape(2, 1, e).astype(f32), 2, 128)    # [2, 1, Ep]

    vp, ep = w1p.shape

    # Fused working set: adj + W1 + Wout + out blocks (double-buffered) + h/s temporaries.
    fused_bytes = 4 * (2 * vp * vp + 2 * vp * ep + 2 * ep * ep + 2 * vp * ep + 2 * vp * ep)

    if fused_bytes <= 32 * 1024 * 1024:
        # ---- Fused single-launch path (MoleRec-scale vocabularies) ----
        out = pl.pallas_call(
            _gcn_fused_kernel,
            out_shape=jax.ShapeDtypeStruct((2, vp, ep), f32),
            grid=(2,),
            in_specs=[
                pl.BlockSpec((None, vp, vp), lambda b: (b, 0, 0)),   # adj for branch b
                pl.BlockSpec((vp, ep), lambda b: (0, 0)),            # W1 (resident)
                pl.BlockSpec((1, ep), lambda b: (0, 0)),             # b1 (resident)
                pl.BlockSpec((None, ep, ep), lambda b: (b, 0, 0)),   # W2 or W3
                pl.BlockSpec((None, 1, ep), lambda b: (b, 0, 0)),    # b2 or b3
            ],
            out_specs=pl.BlockSpec((None, vp, ep), lambda b: (b, 0, 0)),
            compiler_params=pltpu.CompilerParams(
                dimension_semantics=("parallel",),
                vmem_limit_bytes=48 * 1024 * 1024),
        )(adj, w1p, b1p, w_out, b_out)
    else:
        # ---- Two-stage, row-tiled fallback for very large vocabularies ----
        tn = 8
        for cand in (512, 256, 128, 64, 32, 16, 8):
            if vp % cand == 0 and 2 * cand * vp * 4 <= 16 * 1024 * 1024:
                tn = cand
                break
        grid = (2, vp // tn)
        compiler_params = pltpu.CompilerParams(
            dimension_semantics=("parallel", "parallel"),
            vmem_limit_bytes=64 * 1024 * 1024)

        # Stage 1: s[b] = relu(adj[b] @ W1 + b1) @ Wout[b]   -> [2, Vp, Ep]
        s = pl.pallas_call(
            _gcn_stage1_kernel,
            out_shape=jax.ShapeDtypeStruct((2, vp, ep), f32),
            grid=grid,
            in_specs=[
                pl.BlockSpec((None, tn, vp), lambda b, i: (b, i, 0)),
                pl.BlockSpec((vp, ep), lambda b, i: (0, 0)),
                pl.BlockSpec((1, ep), lambda b, i: (0, 0)),
                pl.BlockSpec((None, ep, ep), lambda b, i: (b, 0, 0)),
            ],
            out_specs=pl.BlockSpec((None, tn, ep), lambda b, i: (b, i, 0)),
            compiler_params=compiler_params,
        )(adj, w1p, b1p, w_out)

        # Stage 2: out[b] = adj[b] @ s[b] + bout[b]          -> [2, Vp, Ep]
        out = pl.pallas_call(
            _gcn_stage2_kernel,
            out_shape=jax.ShapeDtypeStruct((2, vp, ep), f32),
            grid=grid,
            in_specs=[
                pl.BlockSpec((None, tn, vp), lambda b, i: (b, i, 0)),
                pl.BlockSpec((None, vp, ep), lambda b, i: (b, 0, 0)),
                pl.BlockSpec((None, 1, ep), lambda b, i: (b, 0, 0)),
            ],
            out_specs=pl.BlockSpec((None, tn, ep), lambda b, i: (b, i, 0)),
            compiler_params=compiler_params,
        )(adj, s, b_out)

    out = out[:, :v, :e]  # drop sublane / lane padding
    return out[0], out[1]


def _reference(ehr_adj_norm, ddi_adj_norm, w1, b1, w2, b2, w3, b3):
    """Pure-JAX reference matching the torch module in eval mode."""
    h_ehr = jnp.maximum(ehr_adj_norm @ w1 + b1, 0.0)
    h_ddi = jnp.maximum(ddi_adj_norm @ w1 + b1, 0.0)
    ehr_out = ehr_adj_norm @ (h_ehr @ w2) + b2
    ddi_out = ddi_adj_norm @ (h_ddi @ w3) + b3
    return ehr_out, ddi_out


if __name__ == "__main__":
    # Small shapes consistent with the module: voc_size drugs, emb_dim embedding.
    voc_size, emb_dim = 128, 64

    key = jax.random.PRNGKey(0)
    ks = jax.random.split(key, 8)

    # Random sparse-ish symmetric 0/1 adjacencies (EHR co-occurrence, DDI).
    ehr_raw = (jax.random.uniform(ks[0], (voc_size, voc_size)) < 0.05).astype(jnp.float32)
    ddi_raw = (jax.random.uniform(ks[1], (voc_size, voc_size)) < 0.05).astype(jnp.float32)
    ehr_raw = jnp.maximum(ehr_raw, ehr_raw.T)
    ddi_raw = jnp.maximum(ddi_raw, ddi_raw.T)

    # adj + I, then row-normalize (as in GCN.__init__).
    eye = jnp.eye(voc_size, dtype=jnp.float32)
    ehr_norm = row_normalize(ehr_raw + eye)
    ddi_norm = row_normalize(ddi_raw + eye)

    # GraphConvolution-style init: uniform(-1/sqrt(out_features), +1/sqrt(out_features)).
    stdv = 1.0 / math.sqrt(emb_dim)
    w1 = jax.random.uniform(ks[2], (voc_size, emb_dim), minval=-stdv, maxval=stdv)
    b1 = jax.random.uniform(ks[3], (emb_dim,), minval=-stdv, maxval=stdv)
    w2 = jax.random.uniform(ks[4], (emb_dim, emb_dim), minval=-stdv, maxval=stdv)
    b2 = jax.random.uniform(ks[5], (emb_dim,), minval=-stdv, maxval=stdv)
    w3 = jax.random.uniform(ks[6], (emb_dim, emb_dim), minval=-stdv, maxval=stdv)
    b3 = jax.random.uniform(ks[7], (emb_dim,), minval=-stdv, maxval=stdv)

    ehr_emb, ddi_emb = gcn_forward(ehr_norm, ddi_norm, w1, b1, w2, b2, w3, b3)
    ehr_emb = jax.block_until_ready(ehr_emb)
    ddi_emb = jax.block_until_ready(ddi_emb)

    ehr_ref, ddi_ref = _reference(ehr_norm, ddi_norm, w1, b1, w2, b2, w3, b3)
    assert ehr_emb.shape == (voc_size, emb_dim)
    assert ddi_emb.shape == (voc_size, emb_dim)
    assert jnp.allclose(ehr_emb, ehr_ref, atol=1e-3, rtol=1e-3), "ehr branch mismatch"
    assert jnp.allclose(ddi_emb, ddi_ref, atol=1e-3, rtol=1e-3), "ddi branch mismatch"

    print("KERNEL_OK")
</pallas_src>

<mosaic_0001>
module attributes {stable_mosaic.version = 11 : i64} {
  func.func @_gcn_fused_kernel(%arg0: i32, %arg1: memref<1x128x128xf32, #tpu.memory_space<vmem>>, %arg2: memref<128x128xf32, #tpu.memory_space<vmem>>, %arg3: memref<1x128xf32, #tpu.memory_space<vmem>>, %arg4: memref<1x128x128xf32, #tpu.memory_space<vmem>>, %arg5: memref<1x1x128xf32, #tpu.memory_space<vmem>>, %arg6: memref<1x128x128xf32, #tpu.memory_space<vmem>>) attributes {dimension_semantics = [#tpu.dimension_semantics<parallel>], iteration_bounds = array<i64: 2>, scalar_prefetch = 0 : i64, scratch_operands = 0 : i64, tpu.core_type = #tpu.core_type<tc>, window_params = [{transform_indices = @transform_0, window_bounds = array<i64: 1, 128, 128>}, {pipeline_mode = #tpu.pipeline_mode<synchronous>, transform_indices = @transform_1, window_bounds = array<i64: 128, 128>}, {pipeline_mode = #tpu.pipeline_mode<synchronous>, transform_indices = @transform_2, window_bounds = array<i64: 1, 128>}, {transform_indices = @transform_3, window_bounds = array<i64: 1, 128, 128>}, {transform_indices = @transform_4, window_bounds = array<i64: 1, 1, 128>}, {transform_indices = @transform_5, window_bounds = array<i64: 1, 128, 128>}]} {
    %c0 = arith.constant 0 : index
    %c0_0 = arith.constant 0 : index
    %c0_1 = arith.constant 0 : index
    %0 = vector.load %arg1[%c0, %c0_0, %c0_1] : memref<1x128x128xf32, #tpu.memory_space<vmem>>, vector<1x128x128xf32>
    %1 = vector.shape_cast %0 : vector<1x128x128xf32> to vector<128x128xf32>
    %c0_2 = arith.constant 0 : index
    %c0_3 = arith.constant 0 : index
    %2 = vector.load %arg2[%c0_2, %c0_3] : memref<128x128xf32, #tpu.memory_space<vmem>>, vector<128x128xf32>
    %cst = arith.constant dense<0.000000e+00> : vector<128x128xf32>
    %3 = tpu.matmul %1, %2, %cst {dimension_numbers = #tpu.dot_dimension_numbers<[1], [0], [0], [1], [0, 0, 1, 1], [], []>} : vector<128x128xf32>, vector<128x128xf32>, vector<128x128xf32> -> vector<128x128xf32>
    %c0_4 = arith.constant 0 : index
    %c0_5 = arith.constant 0 : index
    %4 = vector.load %arg3[%c0_4, %c0_5] : memref<1x128xf32, #tpu.memory_space<vmem>>, vector<1x128xf32>
    %5 = vector.broadcast %4 : vector<1x128xf32> to vector<128x128xf32>
    %6 = arith.addf %3, %5 : vector<128x128xf32>
    %cst_6 = arith.constant 0.000000e+00 : f32
    %7 = vector.broadcast %cst_6 : f32 to vector<128x128xf32>
    %8 = arith.maximumf %6, %7 : vector<128x128xf32>
    %c0_7 = arith.constant 0 : index
    %c0_8 = arith.constant 0 : index
    %c0_9 = arith.constant 0 : index
    %9 = vector.load %arg4[%c0_7, %c0_8, %c0_9] : memref<1x128x128xf32, #tpu.memory_space<vmem>>, vector<1x128x128xf32>
    %10 = vector.shape_cast %9 : vector<1x128x128xf32> to vector<128x128xf32>
    %cst_10 = arith.constant dense<0.000000e+00> : vector<128x128xf32>
    %11 = tpu.matmul %8, %10, %cst_10 {dimension_numbers = #tpu.dot_dimension_numbers<[1], [0], [0], [1], [0, 0, 1, 1], [], []>} : vector<128x128xf32>, vector<128x128xf32>, vector<128x128xf32> -> vector<128x128xf32>
    %cst_11 = arith.constant dense<0.000000e+00> : vector<128x128xf32>
    %12 = tpu.matmul %1, %11, %cst_11 {dimension_numbers = #tpu.dot_dimension_numbers<[1], [0], [0], [1], [0, 0, 1, 1], [], []>} : vector<128x128xf32>, vector<128x128xf32>, vector<128x128xf32> -> vector<128x128xf32>
    %c0_12 = arith.constant 0 : index
    %c0_13 = arith.constant 0 : index
    %c0_14 = arith.constant 0 : index
    %13 = vector.load %arg5[%c0_12, %c0_13, %c0_14] : memref<1x1x128xf32, #tpu.memory_space<vmem>>, vector<1x1x128xf32>
    %14 = vector.shape_cast %13 : vector<1x1x128xf32> to vector<1x128xf32>
    %15 = vector.broadcast %14 : vector<1x128xf32> to vector<128x128xf32>
    %16 = arith.addf %12, %15 : vector<128x128xf32>
    %c0_15 = arith.constant 0 : index
    %c0_16 = arith.constant 0 : index
    %c0_17 = arith.constant 0 : index
    %17 = vector.load %arg6[%c0_15, %c0_16, %c0_17] : memref<1x128x128xf32, #tpu.memory_space<vmem>>, vector<1x128x128xf32>
    %18 = vector.shape_cast %17 : vector<1x128x128xf32> to vector<128x128xf32>
    %19 = vector.shape_cast %16 : vector<128x128xf32> to vector<1x128x128xf32>
    tpu.vector_store %arg6[%c0_15, %c0_16, %c0_17], %19 {strides = array<i32>} : memref<1x128x128xf32, #tpu.memory_space<vmem>>, vector<1x128x128xf32>,
    return
  }
  func.func @transform_0(%arg0: i32) -> (i32, i32, i32) {
    %c0_i32 = arith.constant 0 : i32
    %c0_i32_0 = arith.constant 0 : i32
    %c0_i32_1 = arith.constant 0 : i32
    return %arg0, %c0_i32, %c0_i32_0 : i32, i32, i32
  }
  func.func @transform_1(%arg0: i32) -> (i32, i32) {
    %c0_i32 = arith.constant 0 : i32
    %c0_i32_0 = arith.constant 0 : i32
    %c0_i32_1 = arith.constant 0 : i32
    return %c0_i32, %c0_i32_0 : i32, i32
  }
  func.func @transform_2(%arg0: i32) -> (i32, i32) {
    %c0_i32 = arith.constant 0 : i32
    %c0_i32_0 = arith.constant 0 : i32
    %c0_i32_1 = arith.constant 0 : i32
    return %c0_i32, %c0_i32_0 : i32, i32
  }
  func.func @transform_3(%arg0: i32) -> (i32, i32, i32) {
    %c0_i32 = arith.constant 0 : i32
    %c0_i32_0 = arith.constant 0 : i32
    %c0_i32_1 = arith.constant 0 : i32
    return %arg0, %c0_i32, %c0_i32_0 : i32, i32, i32
  }
  func.func @transform_4(%arg0: i32) -> (i32, i32, i32) {
    %c0_i32 = arith.constant 0 : i32
    %c0_i32_0 = arith.constant 0 : i32
    %c0_i32_1 = arith.constant 0 : i32
    return %arg0, %c0_i32, %c0_i32_0 : i32, i32, i32
  }
  func.func @transform_5(%arg0: i32) -> (i32, i32, i32) {
    %c0_i32 = arith.constant 0 : i32
    %c0_i32_0 = arith.constant 0 : i32
    %c0_i32_1 = arith.constant 0 : i32
    return %arg0, %c0_i32, %c0_i32_0 : i32, i32, i32
  }
}

</mosaic_0001>

<bundles_post_ra>
// kernel: tpu_custom_call.1
= control target key start
LH: loop header
LB: loop body
LE: loop exit
PB: predicated region body
PF: predicated region fallthrough
CT: control target
= control target key end

     0   :  { %10 = vsyncpa [#allocation3], 0  ;;  %s2023_s0 = inlined_call_operand.hbm [shape: f32[2,128,128], index: 0, kind: input, shape index: {}]   ;;  %s2024_s1 = inlined_call_operand.hbm [shape: f32[128,128], index: 1, kind: input, shape index: {}]   ;;  %s2025_s2 = inlined_call_operand.vmem [shape: f32[1,128], index: 2, kind: input, shape index: {}]   ;;  %s2026_s3 = inlined_call_operand.hbm [shape: f32[2,128,128], index: 3, kind: input, shape index: {}]   ;;  %s2027_s4 = inlined_call_operand.vmem [shape: f32[2,1,128], index: 4, kind: input, shape index: {}]   ;;  %s2028_s5 = inlined_call_operand.hbm [shape: f32[2,128,128], index: 5, kind: output, shape index: {}]  }
   0x1   :  { %12 = vsyncpa [#allocation3 + $0x1], 0 }
   0x2   :  { %13 = vsyncpa [#allocation6], 0 }
   0x3   :  { %14 = vsyncpa [#allocation4], 0 }
   0x4   :  { %16 = vsyncpa [#allocation4 + $0x1], 0  ;;  %s1633_s18 = smov 0   ;;  %s1635_s19 = smov 0  }
   0x5   :  { %s1637_s20 = smov 0   ;;  %s1639_s21 = smov 0  }
   0x6 LB: > { %s1654_s22 = sadd.s32 1, %s1593_s21   ;;  %s29_s23 = sadd.s32 1, %s1589_s20  ;;  %s1593_s21 = sphi %s1639_s21, %s2051_s21   ;;  %s1589_s20 = sphi %s1637_s20, %s2050_s20   ;;  %s1585_s19 = sphi %s1635_s19, %s2049_s19   ;;  %s1581_s18 = sphi %s1633_s18, %s2048_s18  }
   0x7   : > { %s26_s24 = ssub.s32 %s1593_s21, %s1654_s22  ;;  %p36_p0 = scmp.ne.s32.totalorder %s1589_s20, %s1585_s19 }
   0x8   : > { %p27_p1 = scmp.eq.s32.totalorder %s26_s24, 0  ;;  %p37_p2 = scmp.eq.s32.totalorder %s1593_s21, 0 }
   0x9   : > { %p1391_p5 = scmp.lt.s32.totalorder %s1593_s21, 2  ;;  %s202_s26 = sand.u32 1, %s1593_s21  }
   0xa   : > { %s1663_s25 = scalar_select %p27_p1, %s1589_s20, %s29_s23  }
   0xb   : > { %p38_p3 = por %p37_p2, %p36_p0  ;;  %s204_s27 = sand.u32 1, %s1589_s20  }
   0xc   : > { %s1672_s28 = sshll.u32 %s204_s27, 7  ;;  %s986_s29 = sshll.u32 %s1593_s21, 11 }
   0xd   : > { %s1680_s7 = scalar_lea.hbm %s2023_s0, %s986_s29  ;;  %s206_s8 = scalar_lea.vmem [#allocation2], %s1672_s28 }
   0xe   : > { %s213_s9 = sshll.u32 %s206_s8, 4  ;;  %p1683_p6 = pnand %p1391_p5, %p38_p3  ;;  %s1687_s9 = int_to_ptr.vmem [resolvable:$true] %s213_s9 }
   0xf   : > { %s1689_s11 = scalar_lea.sflag [#allocation3], %s202_s26  ;;  %s1431_s12 = scalar_lea.hbm %s1680_s7, 2048 }
  0x10   : > { %p1432_p7 = scmp.ne.s32.totalorder %s1680_s7, %s1431_s12  ;;  %p1433_p8 = pneg %p1683_p6 }
  0x11   : > { %s1436_s15 = scalar_lea.hbm %s2023_s0, 4096  ;;  %p1437_p11 = scmp.lt.u32.totalorder %s1680_s7, %s2023_s0 }
  0x12   : > { %p1434_p9 = pnand %p1433_p8, %p1432_p7  ;;  %p1438_p12 = scmp.lt.u32.totalorder %s1436_s15, %s1431_s12 }
  0x13   : > { %p1440_p1 = scmp.lt.u32.totalorder %s1431_s12, %s1680_s7 }
  0x14   : > { %p1435_p10 = pneg %p1434_p9  ;;  %p1439_p13 = por %p1438_p12, %p1437_p11 }
  0x16   : > { %p1441_p2 = por %p1440_p1, %p1439_p13 }
  0x18   : > { %p1442_p3 = pnand %p1441_p2, %p1435_p10 }
  0x1a   : > { %1445 = shalt.err (!%p1442_p3)
}
  0x1b   : > { %s1446_s23 = scalar_lea.vmem %s1687_s9, 2048  ;;  %s1595_s24 = smov [#allocation2]  }
  0x1c   : > { %p1447_p5 = scmp.ne.s32.totalorder %s1687_s9, %s1446_s23  ;;  %s1451_s26 = sshll.u32 %s1595_s24, 4  ;;  %s1452_s26 = int_to_ptr.vmem [resolvable:$false] %s1451_s26 }
  0x1d   : > { %s1453_s27 = scalar_lea.vmem %s1452_s26, 4096  ;;  %p1454_p4 = scmp.lt.s32.totalorder %s1687_s9, %s1452_s26 }
  0x1e   : > { %p1449_p7 = pnand %p1447_p5, %p1433_p8  ;;  %p1455_p11 = scmp.lt.s32.totalorder %s1453_s27, %s1446_s23 }
  0x20   : > { %p1450_p9 = pneg %p1449_p7  ;;  %p1456_p12 = por %p1455_p11, %p1454_p4 }
  0x22   : > { %p1457_p13 = pnand %p1456_p12, %p1450_p9 }
  0x24   : > { %1460 = shalt.err (!%p1457_p13)
}
  0x25   : > { %s1596_s30 = smov 128   ;;  %s1597_s6 = smov 8  }
  0x26   : > { %1382 = dma.hbm_to_vmem [thread:$0]  (!%p1683_p6), %s1680_s7, 2048, %s1687_s9, %s1689_s11, %s1596_s30, %s1596_s30, %s1597_s6  }
  0x27   : > { %s227_s8 = scalar_lea.vmem [#allocation7], %s1672_s28  ;;  %s1722_s13 = sadd.s32 4294967295, %s1593_s21  }
  0x28   : > { %s234_s12 = sshll.u32 %s227_s8, 4  ;;  %s964_s14 = sadd.s32 4294967294, %s1593_s21   ;;  %s1755_s12 = int_to_ptr.vmem [resolvable:$true] %s234_s12 }
  0x29   : > { %p42_p4 = scmp.ne.s32.totalorder %s1585_s19, %s1581_s18  ;;  %p2029_p10 = scmp.eq.s32.totalorder %s1722_s13, 0 }
  0x2a   : > { %p160_p1 = scmp.eq.s32.totalorder %s1722_s13, 1  ;;  %p166_p2 = scmp.eq.s32.totalorder %s964_s14, 1 }
  0x2b   : > { %p1731_p3 = por %p2029_p10, %p42_p4  ;;  %p965_p5 = scmp.ge.s32.totalorder %s1593_s21, 1 }
  0x2c   : > { %p1739_p7 = por %p160_p1, %p36_p0  ;;  %p1743_p9 = por %p166_p2, %p42_p4 }
  0x2d   : > { %s2034_s15 = scalar_select %p1731_p3, 1, 0 }
  0x2e   : > { %s2035_s28 = scalar_select %p1739_p7, 1, 0 }
  0x2f   : > { %s2036_s7 = scalar_select %p1743_p9, 1, 0 }
  0x30   : > { %p173_p11 = scmp.lt.s32.totalorder %s1593_s21, 3  ;;  %s1753_s17 = scalar_lea.hbm %s2026_s3, %s986_s29 }
  0x31   : > { %s1598_s24 = smov [#allocation5]   ;;  %s1461_s27 = scalar_lea.hbm %s1753_s17, 2048 }
  0x32   : > { %p1757_p0 = pnand %p965_p5, %p173_p11  ;;  %s1761_s26 = sshll.u32 %s1598_s24, 4  ;;  %s186_s26 = int_to_ptr.vmem [resolvable:$true] %s1761_s26 }
  0x33   : > { %p1462_p13 = scmp.ne.s32.totalorder %s1753_s17, %s1461_s27  ;;  %s1466_s14 = scalar_lea.hbm %s2026_s3, 4096 }
  0x34   : > { %s2037_s23 = scalar_select %p1757_p0, 1, 0 }
  0x35   : > { %p1464_p4 = pnand %p1462_p13, %p1433_p8  ;;  %p1467_p2 = scmp.lt.u32.totalorder %s1753_s17, %s2026_s3 }
  0x36   : > { %p1468_p5 = scmp.lt.u32.totalorder %s1466_s14, %s1461_s27  ;;  %p1470_p10 = scmp.lt.u32.totalorder %s1461_s27, %s1753_s17 }
  0x37   : > { %p1465_p1 = pneg %p1464_p4 }
  0x38   : > { %p1469_p11 = por %p1468_p5, %p1467_p2 }
  0x3a   : > { %p1471_p9 = por %p1470_p10, %p1469_p11 }
  0x3c   : > { %p1472_p7 = pnand %p1471_p9, %p1465_p1 }
  0x3e   : > { %1475 = shalt.err (!%p1472_p7)
}
  0x3f   : > { %s1476_s24 = scalar_lea.vmem %s1755_s12, 2048  ;;  %s1599_s29 = smov [#allocation7]  }
  0x40   : > { %p1477_p13 = scmp.ne.s32.totalorder %s1755_s12, %s1476_s24  ;;  %s1481_s8 = sshll.u32 %s1599_s29, 4  ;;  %s1482_s8 = int_to_ptr.vmem [resolvable:$false] %s1481_s8 }
  0x41   : > { %s1483_s9 = scalar_lea.vmem %s1482_s8, 4096  ;;  %p1484_p3 = scmp.lt.s32.totalorder %s1755_s12, %s1482_s8 }
  0x42   : > { %p1479_p4 = pnand %p1477_p13, %p1433_p8  ;;  %p1485_p2 = scmp.lt.s32.totalorder %s1483_s9, %s1476_s24 }
  0x44   : > { %p1480_p12 = pneg %p1479_p4  ;;  %p1486_p5 = por %p1485_p2, %p1484_p3 }
  0x46   : > { %p1487_p10 = pnand %p1486_p5, %p1480_p12 }
  0x48   : > { %1490 = shalt.err (!%p1487_p10)
}
  0x49   : > { %1385 = dma.hbm_to_vmem [thread:$0]  (!%p1683_p6), %s1753_s17, 2048, %s1755_s12, %s1689_s11, %s1596_s30, %s1596_s30, %s1597_s6  }
  0x4a   : > { %p2038_p8 = scmp.eq.s32.totalorder %s1722_s13, 0  ;;  %p2039_p7 = pneg %p1757_p0 }
  0x4b   : > { %s1491_s16 = scalar_lea.hbm %s2024_s1, 2048 }
  0x4c   : > { %p1798_p9 = pnand %p2039_p7, %p2038_p8  ;;  %p1492_p3 = scmp.ne.s32.totalorder %s2024_s1, %s1491_s16 }
  0x4d   : > { %p1498_p11 = scmp.lt.u32.totalorder %s1491_s16, %s2024_s1 }
  0x4e   : > { %p1493_p12 = pneg %p1798_p9 }
  0x50   : > { %p1494_p6 = pnand %p1493_p12, %p1492_p3 }
  0x52   : > { %p1495_p1 = pneg %p1494_p6 }
  0x54   : > { %p1500_p13 = pnand %p1498_p11, %p1495_p1 }
  0x56   : > { %1503 = shalt.err (!%p1500_p13)
}
  0x57   : > { %s1504_s17 = scalar_lea.vmem %s186_s26, 2048  ;;  %p1512_p10 = scmp.lt.s32.totalorder %s186_s26, %s186_s26 }
  0x58   : > { %p1505_p4 = scmp.ne.s32.totalorder %s186_s26, %s1504_s17  ;;  %p1513_p8 = scmp.lt.s32.totalorder %s1504_s17, %s1504_s17 }
  0x5a   : > { %p1507_p2 = pnand %p1505_p4, %p1493_p12  ;;  %p1514_p7 = por %p1513_p8, %p1512_p10 }
  0x5c   : > { %p1508_p5 = pneg %p1507_p2 }
  0x5e   : > { %p1515_p0 = pnand %p1514_p7, %p1508_p5 }
  0x60   : > { %1518 = shalt.err (!%p1515_p0)
}
  0x61   : > { %1378 = dma.hbm_to_vmem [thread:$0]  (!%p1798_p9), %s2024_s1, 2048, %s186_s26, [#allocation6], %s1596_s30, %s1596_s30, %s1597_s6  }
  0x62   : > { %p2041_p3 = scmp.ne.s32.totalorder %s2037_s23, 0 }
  0x63   : > { %s254_s14 = sand.u32 (!%p2041_p3), 1, %s1722_s13   ;;  %s256_s10 = sand.u32 (!%p2041_p3), 1, %s1585_s19  }
  0x64   : > { %252 = sbr.rel (%p2041_p3) target bundleno = 856 (0x358), region = 40  ;;  %s1827_s16 = sshll.u32 (!%p2041_p3), %s256_s10, 7 }
  0x65   : > { %s255_s27 = scalar_lea.sflag (!%p2041_p3), [#allocation3], %s254_s14  ;;  %s1830_s24 = scalar_lea.vmem (!%p2041_p3), [#allocation2], %s1827_s16 }
  0x66   : > { %p2042_p0 = scmp.ne.s32.totalorder (!%p2041_p3), %s2034_s15, 0 }
  0x6b   : > { %1564 = dma.done.wait (%p2042_p0), %s255_s27, 2048  }
  0x6c   : > { %1566 = vsyncadd (%p2042_p0), %s255_s27, 4294965248  ;;  %p2043_p9 = scmp.eq.s32.totalorder %s1722_s13, 0 }
  0x6e   : > { %1568 = dma.done.wait (%p2043_p9), [#allocation6], 2048   ;;  %p2044_p12 = pmov %p2043_p9 }
  0x6f   : > { %s1841_s30 = scalar_lea.vmem [#allocation7], %s1827_s16 }
  0x70   : > { %1570 = vsyncadd (%p2044_p12), [#allocation6], 4294965248 }
  0x71   : > { %1572 = dma.done.wait (%p2042_p0), %s255_s27, 2048  }
  0x72   : > { %1574 = vsyncadd (%p2042_p0), %s255_s27, 4294965248  ;;  %v325_v0 = vld [vmem:[#allocation5] sm:$0xff]  ;;  %v326_v1 = vld [vmem:[#allocation5 + $0x8] sm:$0xff]  ;;  %p306_p6 = scmp.lt.s32.totalorder %s1722_s13, 1  ;;  %s1952_s12 = scalar_lea.vmem [#allocation8], %s1827_s16 }
  0x73   : > { %v327_v2 = vld [vmem:[#allocation5 + $0x10] sm:$0xff]  ;;  %v1253_v3 = vpack.c.bf16 %v326_v1, %v325_v0  ;;  %v328_v4 = vld [vmem:[#allocation5 + $0x18] sm:$0xff]  ;;  %v329_v6 = vld [vmem:[#allocation5 + $0x20] sm:$0xff]  ;;  %s988_s17 = sshll.u32 %s1722_s13, 11  ;;  %s852_s8 = sshll.u32 %s1952_s12, 4  ;;  %s1973_s8 = int_to_ptr.vmem [resolvable:$true] %s852_s8 }
  0x74   : > { %v1257_v5 = vpack.c.bf16 %v328_v4, %v327_v2  ;;  %v330_v7 = vld [vmem:[#allocation5 + $0x28] sm:$0xff]  ;;  %v1848_v9 = vld [vmem:[%s1830_s24] sm:$0xff]  ;;  %v331_v10 = vld [vmem:[#allocation5 + $0x30] sm:$0xff]  ;;  %s307_s23 = scalar_select %p306_p6, %s1722_s13, 1 }
  0x75   : > { %1254 = vmatprep.subr.bf16.mxu0 %v1253_v3  ;;  %v1261_v8 = vpack.c.bf16 %v330_v7, %v329_v6  ;;  %v332_v11 = vld [vmem:[#allocation5 + $0x38] sm:$0xff]  ;;  %1117 = vmatprep.mubr.f32.mxu0 %v1848_v9  ;;  %v333_v13 = vld [vmem:[#allocation5 + $0x40] sm:$0xff]  ;;  %v334_v14 = vld [vmem:[#allocation5 + $0x48] sm:$0xff]  ;;  %s1971_s13 = scalar_lea.hbm %s2028_s5, %s988_s17  ;;  %s1981_s16 = scalar_lea.sflag [#allocation4], %s256_s10 }
  0x76   : > { %1256 = vmatpush3.bf16.msra.mxu0 %v1253_v3  ;;  %v1265_v12 = vpack.c.bf16 %v332_v11, %v331_v10  ;;  %v509_v15 = vld [vmem:[%s1841_s30] sm:$0xff]  ;;  %v510_v16 = vld [vmem:[%s1841_s30 + $0x8] sm:$0xff]  ;;  %v511_v17 = vld [vmem:[%s1841_s30 + $0x10] sm:$0xff]  ;;  %v1269_v21 = vpack.c.bf16 %v334_v14, %v333_v13  ;;  %s308_s11 = scalar_lea.vmem %s2027_s4, %s307_s23  ;;  %s1519_s27 = scalar_lea.vmem %s1973_s8, 2048 }
  0x77   : > { %1258 = vmatprep.subr.bf16.mxu0 %v1257_v5  ;;  %v512_v18 = vld [vmem:[%s1841_s30 + $0x18] sm:$0xff]  ;;  %v1285_v19 = vpack.c.bf16 %v510_v16, %v509_v15  ;;  %v513_v22 = vld [vmem:[%s1841_s30 + $0x20] sm:$0xff]  ;;  %v514_v23 = vld [vmem:[%s1841_s30 + $0x28] sm:$0xff]  ;;  %p1520_p1 = scmp.ne.s32.totalorder %s1973_s8, %s1519_s27  ;;  %p2045_p11 = scmp.ne.s32.totalorder %s2035_s28, 0 }
  0x78   : > { %v1289_v20 = vpack.c.bf16 %v512_v18, %v511_v17  ;;  %v335_v24 = vld [vmem:[#allocation5 + $0x50] sm:$0xff]  ;;  %v336_v25 = vld [vmem:[#allocation5 + $0x58] sm:$0xff]  ;;  %v1293_v26 = vpack.c.bf16 %v514_v23, %v513_v22  ;;  %v337_v30 = vld [vmem:[#allocation5 + $0x60] sm:$0xff] }
  0x79   : > { %1286 = vmatprep.subr.bf16.mxu1 %v1285_v19  ;;  %v1273_v27 = vpack.c.bf16 %v336_v25, %v335_v24  ;;  %v515_v28 = vld [vmem:[%s1841_s30 + $0x30] sm:$0xff]  ;;  %v516_v29 = vld [vmem:[%s1841_s30 + $0x38] sm:$0xff]  ;;  %v338_v31 = vld [vmem:[#allocation5 + $0x68] sm:$0xff]  ;;  %p1521_p13 = pnand %p1520_p1, %p2045_p11 }
  0x7a   : > { %1260 = vmatpush3.bf16.msra.mxu0 %v1257_v5  ;;  %1288 = vmatpush3.bf16.msra.mxu1 %v1285_v19  ;;  %v1297_v32 = vpack.c.bf16 %v516_v29, %v515_v28  ;;  %v1277_v33 = vpack.c.bf16 %v338_v31, %v337_v30  ;;  %v517_v34 = vld [vmem:[%s1841_s30 + $0x40] sm:$0xff]  ;;  %v518_v35 = vld [vmem:[%s1841_s30 + $0x48] sm:$0xff]  ;;  %v339_v36 = vld [vmem:[#allocation5 + $0x70] sm:$0xff] }
  0x7b   : > { %1262 = vmatprep.subr.bf16.mxu0 %v1261_v8  ;;  %1290 = vmatprep.subr.bf16.mxu1 %v1289_v20  ;;  %v340_v37 = vld [vmem:[#allocation5 + $0x78] sm:$0xff]  ;;  %v1301_v38 = vpack.c.bf16 %v518_v35, %v517_v34  ;;  %v519_v40 = vld [vmem:[%s1841_s30 + $0x50] sm:$0xff]  ;;  %v521_v43 = vld [vmem:[%s1841_s30 + $0x60] sm:$0xff]  ;;  %p1522_p4 = pneg %p1521_p13 }
  0x7c   : > { %v1281_v39 = vpack.c.bf16 %v340_v37, %v339_v36  ;;  %v520_v41 = vld [vmem:[%s1841_s30 + $0x58] sm:$0xff]  ;;  %v522_v44 = vld [vmem:[%s1841_s30 + $0x68] sm:$0xff]  ;;  %v1869_v47 = vld [vmem:[%s1830_s24 + $0x10] sm:$0xff] }
  0x7d   : > { %v1305_v42 = vpack.c.bf16 %v520_v41, %v519_v40  ;;  %v1866_v45 = vld [vmem:[%s1830_s24 + $0x8] sm:$0xff]  ;;  %v1309_v46 = vpack.c.bf16 %v522_v44, %v521_v43  ;;  %v1874_v48 = vld [vmem:[%s1830_s24 + $0x18] sm:$0xff]  ;;  %v1877_v49 = vld [vmem:[%s1830_s24 + $0x20] sm:$0xff] }
  0x7e   : > { %1264 = vmatpush3.bf16.msra.mxu0 %v1261_v8  ;;  %1292 = vmatpush3.bf16.msra.mxu1 %v1289_v20  ;;  %v1882_v50 = vld [vmem:[%s1830_s24 + $0x28] sm:$0xff]  ;;  %v1885_v51 = vld [vmem:[%s1830_s24 + $0x30] sm:$0xff]  ;;  %v1890_v52 = vld [vmem:[%s1830_s24 + $0x38] sm:$0xff] }
  0x7f   : > { %1266 = vmatprep.subr.bf16.mxu0 %v1265_v12  ;;  %1294 = vmatprep.subr.bf16.mxu1 %v1293_v26  ;;  %v1893_v53 = vld [vmem:[%s1830_s24 + $0x40] sm:$0xff]  ;;  %v1898_v54 = vld [vmem:[%s1830_s24 + $0x48] sm:$0xff]  ;;  %v1901_v55 = vld [vmem:[%s1830_s24 + $0x50] sm:$0xff] }
  0x80   : > { %v1906_v56 = vld [vmem:[%s1830_s24 + $0x58] sm:$0xff]  ;;  %v1909_v57 = vld [vmem:[%s1830_s24 + $0x60] sm:$0xff]  ;;  %v1914_v58 = vld [vmem:[%s1830_s24 + $0x68] sm:$0xff] }
  0x81   : > { %v1917_v59 = vld [vmem:[%s1830_s24 + $0x70] sm:$0xff]  ;;  %v1922_v60 = vld [vmem:[%s1830_s24 + $0x78] sm:$0xff]  ;;  %v979_v0 = vld [vmem:[%s2025_s2] ss:$0 sm:$0xff]  ;;  %s1600_s24 = smov [#allocation8]  }
  0x82   : > { %1268 = vmatpush3.bf16.msra.mxu0 %v1265_v12  ;;  %1296 = vmatpush3.bf16.msra.mxu1 %v1293_v26  ;;  %v523_v61 = vld [vmem:[%s1841_s30 + $0x70] sm:$0xff]  ;;  %v524_v62 = vld [vmem:[%s1841_s30 + $0x78] sm:$0xff]  ;;  %s1523_s30 = sshll.u32 %s1600_s24, 4  ;;  %s1524_s30 = int_to_ptr.vmem [resolvable:$false] %s1523_s30 }
  0x83   : > { %1270 = vmatprep.subr.bf16.mxu0 %v1269_v21  ;;  %1298 = vmatprep.subr.bf16.mxu1 %v1297_v32  ;;  %v1313_v63 = vpack.c.bf16 %v524_v62, %v523_v61  ;;  %s1525_s6 = scalar_lea.vmem %s1524_s30, 4096  ;;  %p1526_p2 = scmp.lt.s32.totalorder %s1973_s8, %s1524_s30 }
  0x84   : > { %p1527_p5 = scmp.lt.s32.totalorder %s1525_s6, %s1519_s27 }
  0x86   : > { %1272 = vmatpush3.bf16.msra.mxu0 %v1269_v21  ;;  %1300 = vmatpush3.bf16.msra.mxu1 %v1297_v32  ;;  %p1528_p10 = por %p1527_p5, %p1526_p2 }
  0x87   : > { %1274 = vmatprep.subr.bf16.mxu0 %v1273_v27  ;;  %1302 = vmatprep.subr.bf16.mxu1 %v1301_v38 }
  0x88   : > { %p1529_p8 = pnand %p1528_p10, %p1522_p4 }
  0x8a   : > { %1276 = vmatpush3.bf16.msra.mxu0 %v1273_v27  ;;  %1304 = vmatpush3.bf16.msra.mxu1 %v1301_v38 }
  0x8b   : > { %1278 = vmatprep.subr.bf16.mxu0 %v1277_v33  ;;  %1306 = vmatprep.subr.bf16.mxu1 %v1305_v42 }
  0x8e   : > { %1280 = vmatpush3.bf16.msra.mxu0 %v1277_v33  ;;  %1308 = vmatpush3.bf16.msra.mxu1 %v1305_v42 }
  0x8f   : > { %1282 = vmatprep.subr.bf16.mxu0 %v1281_v39  ;;  %1310 = vmatprep.subr.bf16.mxu1 %v1309_v46 }
  0x92   : > { %1284 = vmatpush3.bf16.msra.mxu0 %v1281_v39  ;;  %1312 = vmatpush3.bf16.msra.mxu1 %v1309_v46 }
  0x93   : > { %1314 = vmatprep.subr.bf16.mxu1 %v1313_v63 }
  0x95   : > { %1118 = vmatmul.mubr.f32.vlgmr.msra.gmra.mrb[0].mxu0 %v1866_v45 }
  0x96   : > { %1120 = vmatprep.mubr.f32.mxu0 %v1869_v47  ;;  %1316 = vmatpush3.bf16.msra.mxu1 %v1313_v63 }
  0x99   : > { %1121 = vmatmul.mubr.f32.gmra.mrb[2].mxu0 %v1874_v48 }
  0x9a   : > { %1123 = vmatprep.mubr.f32.mxu0 %v1877_v49 }
  0x9d   : > { %1124 = vmatmul.mubr.f32.gmra.mrb[4].mxu0 %v1882_v50 }
  0x9e   : > { %1126 = vmatprep.mubr.f32.mxu0 %v1885_v51 }
  0xa1   : > { %1127 = vmatmul.mubr.f32.gmra.mrb[6].mxu0 %v1890_v52 }
  0xa2   : > { %1129 = vmatprep.mubr.f32.mxu0 %v1893_v53 }
  0xa5   : > { %1130 = vmatmul.mubr.f32.gmra.mrb[8].mxu0 %v1898_v54 }
  0xa6   : > { %1132 = vmatprep.mubr.f32.mxu0 %v1901_v55 }
  0xa9   : > { %1133 = vmatmul.mubr.f32.gmra.mrb[10].mxu0 %v1906_v56 }
  0xaa   : > { %1135 = vmatprep.mubr.f32.mxu0 %v1909_v57 }
  0xad   : > { %1136 = vmatmul.mubr.f32.gmra.mrb[12].mxu0 %v1914_v58 }
  0xae   : > { %1138 = vmatprep.mubr.f32.mxu0 %v1917_v59 }
  0xb1   : > { %1139 = vmatmul.mubr.f32.gmra.mrb[14].mxu0 %v1922_v60 }
  0xb2   : > { %1229 = vmatprep.mubr.f32.mxu0 %v1848_v9 }
 0x168   : > { %v1119_v1 = vpop.f32.mrb[0].mxu0 }
 0x169   : > { %v420_v2 = vadd.f32 %v1119_v1, %v979_v0  ;;  %v414_v3 = vpop.f32.mrb[1].mxu0 }
 0x16a   : > { %v415_v4 = vadd.f32 %v979_v0, %v414_v3 }
 0x16b   : > { %v494_v7 = vmax.f32 %v420_v2, 0.0 }
 0x16c   : > { %v1122_v5 = vpop.f32.mrb[2].mxu0  ;;  %v493_v6 = vmax.f32 %v415_v4, 0.0 }
 0x16d   : > { %v430_v8 = vadd.f32 %v1122_v5, %v979_v0  ;;  %v424_v10 = vpop.f32.mrb[3].mxu0 }
 0x16e   : > { %v425_v11 = vadd.f32 %v979_v0, %v424_v10  ;;  %1173 = vmatprep.mubr.f32.mxu1 %v493_v6 }
 0x16f   : > { %1174 = vmatmul.mubr.f32.vlgmr.msra.gmra.mrb[0].mxu1 %v494_v7  ;;  %v496_v13 = vmax.f32 %v430_v8, 0.0 }
 0x170   : > { %v495_v9 = vmax.f32 %v425_v11, 0.0  ;;  %v1125_v12 = vpop.f32.mrb[4].mxu0 }
 0x171   : > { %v440_v14 = vadd.f32 %v1125_v12, %v979_v0  ;;  %v434_v15 = vpop.f32.mrb[5].mxu0 }
 0x172   : > { %v435_v16 = vadd.f32 %v979_v0, %v434_v15  ;;  %1176 = vmatprep.mubr.f32.mxu1 %v495_v9 }
 0x173   : > { %1177 = vmatmul.mubr.f32.gmra.mrb[2].mxu1 %v496_v13  ;;  %v498_v19 = vmax.f32 %v440_v14, 0.0 }
 0x174   : > { %v497_v17 = vmax.f32 %v435_v16, 0.0  ;;  %v1128_v18 = vpop.f32.mrb[6].mxu0 }
 0x175   : > { %v450_v20 = vadd.f32 %v1128_v18, %v979_v0  ;;  %v444_v21 = vpop.f32.mrb[7].mxu0 }
 0x176   : > { %v445_v22 = vadd.f32 %v979_v0, %v444_v21  ;;  %1179 = vmatprep.mubr.f32.mxu1 %v497_v17 }
 0x177   : > { %1180 = vmatmul.mubr.f32.gmra.mrb[4].mxu1 %v498_v19  ;;  %v500_v25 = vmax.f32 %v450_v20, 0.0 }
 0x178   : > { %v499_v23 = vmax.f32 %v445_v22, 0.0  ;;  %v1131_v24 = vpop.f32.mrb[8].mxu0 }
 0x179   : > { %v460_v26 = vadd.f32 %v1131_v24, %v979_v0  ;;  %v454_v27 = vpop.f32.mrb[9].mxu0 }
 0x17a   : > { %v455_v28 = vadd.f32 %v979_v0, %v454_v27  ;;  %1182 = vmatprep.mubr.f32.mxu1 %v499_v23 }
 0x17b   : > { %1183 = vmatmul.mubr.f32.gmra.mrb[6].mxu1 %v500_v25  ;;  %v502_v31 = vmax.f32 %v460_v26, 0.0 }
 0x17c   : > { %v501_v29 = vmax.f32 %v455_v28, 0.0  ;;  %v1134_v30 = vpop.f32.mrb[10].mxu0 }
 0x17d   : > { %v470_v32 = vadd.f32 %v1134_v30, %v979_v0  ;;  %v464_v33 = vpop.f32.mrb[11].mxu0 }
 0x17e   : > { %v465_v34 = vadd.f32 %v979_v0, %v464_v33  ;;  %1185 = vmatprep.mubr.f32.mxu1 %v501_v29 }
 0x17f   : > { %1186 = vmatmul.mubr.f32.gmra.mrb[8].mxu1 %v502_v31  ;;  %v504_v37 = vmax.f32 %v470_v32, 0.0 }
 0x180   : > { %v503_v35 = vmax.f32 %v465_v34, 0.0  ;;  %v1137_v36 = vpop.f32.mrb[12].mxu0 }
 0x181   : > { %v480_v38 = vadd.f32 %v1137_v36, %v979_v0  ;;  %v474_v39 = vpop.f32.mrb[13].mxu0 }
 0x182   : > { %v475_v40 = vadd.f32 %v979_v0, %v474_v39  ;;  %1188 = vmatprep.mubr.f32.mxu1 %v503_v35 }
 0x183   : > { %1189 = vmatmul.mubr.f32.gmra.mrb[10].mxu1 %v504_v37  ;;  %v506_v43 = vmax.f32 %v480_v38, 0.0 }
 0x184   : > { %v505_v41 = vmax.f32 %v475_v40, 0.0  ;;  %v1140_v42 = vpop.f32.mrb[14].mxu0 }
 0x185   : > { %v490_v44 = vadd.f32 %v1140_v42, %v979_v0  ;;  %v484_v46 = vpop.f32.mrb[15].mxu0 }
 0x186   : > { %v485_v61 = vadd.f32 %v979_v0, %v484_v46  ;;  %1191 = vmatprep.mubr.f32.mxu1 %v505_v41 }
 0x187   : > { %1192 = vmatmul.mubr.f32.gmra.mrb[12].mxu1 %v506_v43  ;;  %v508_v63 = vmax.f32 %v490_v44, 0.0 }
 0x188   : > { %v507_v62 = vmax.f32 %v485_v61, 0.0 }
 0x18a   : > { %1194 = vmatprep.mubr.f32.mxu1 %v507_v62 }
 0x18b   : > { %1195 = vmatmul.mubr.f32.gmra.mrb[14].mxu1 %v508_v63 }
 0x18c   : > { %1241 = vmatprep.mubr.f32.mxu1 %v1893_v53 }
 0x242   : > { %v1175_v1 = vpop.f32.mrb[0].mxu1 }
 0x243   : > { %v591_v2 = vpop.f32.mrb[1].mxu1 }
 0x244   : > { %v1317_v3 = vpack.c.bf16 %v1175_v1, %v591_v2 }
 0x246   : > { %v1178_v4 = vpop.f32.mrb[2].mxu1  ;;  %1318 = vmatprep.subr.bf16.mxu0 %v1317_v3  ;;  %1349 = vmatprep.subr.bf16.mxu1 %v1317_v3 }
 0x247   : > { %v601_v5 = vpop.f32.mrb[3].mxu1  ;;  %1320 = vmatpush3.bf16.msra.mxu0 %v1317_v3  ;;  %1357 = vmatpush3.bf16.msra.mxu1 %v1317_v3 }
 0x248   : > { %v1321_v6 = vpack.c.bf16 %v1178_v4, %v601_v5 }
 0x24a   : > { %v1181_v7 = vpop.f32.mrb[4].mxu1  ;;  %1322 = vmatprep.subr.bf16.mxu0 %v1321_v6  ;;  %1350 = vmatprep.subr.bf16.mxu1 %v1321_v6 }
 0x24b   : > { %v611_v0 = vpop.f32.mrb[5].mxu1  ;;  %1324 = vmatpush3.bf16.msra.mxu0 %v1321_v6  ;;  %1358 = vmatpush3.bf16.msra.mxu1 %v1321_v6 }
 0x24c   : > { %v1325_v8 = vpack.c.bf16 %v1181_v7, %v611_v0 }
 0x24e   : > { %v1184_v10 = vpop.f32.mrb[6].mxu1  ;;  %1326 = vmatprep.subr.bf16.mxu0 %v1325_v8  ;;  %1351 = vmatprep.subr.bf16.mxu1 %v1325_v8 }
 0x24f   : > { %v621_v53 = vpop.f32.mrb[7].mxu1  ;;  %1328 = vmatpush3.bf16.msra.mxu0 %v1325_v8  ;;  %1359 = vmatpush3.bf16.msra.mxu1 %v1325_v8 }
 0x250   : > { %v1329_v11 = vpack.c.bf16 %v1184_v10, %v621_v53 }
 0x252   : > { %v1187_v9 = vpop.f32.mrb[8].mxu1  ;;  %1330 = vmatprep.subr.bf16.mxu0 %v1329_v11  ;;  %1352 = vmatprep.subr.bf16.mxu1 %v1329_v11 }
 0x253   : > { %v631_v12 = vpop.f32.mrb[9].mxu1  ;;  %1332 = vmatpush3.bf16.msra.mxu0 %v1329_v11  ;;  %1360 = vmatpush3.bf16.msra.mxu1 %v1329_v11 }
 0x254   : > { %v1333_v13 = vpack.c.bf16 %v1187_v9, %v631_v12 }
 0x256   : > { %v1190_v14 = vpop.f32.mrb[10].mxu1  ;;  %1334 = vmatprep.subr.bf16.mxu0 %v1333_v13  ;;  %1353 = vmatprep.subr.bf16.mxu1 %v1333_v13 }
 0x257   : > { %v641_v15 = vpop.f32.mrb[11].mxu1  ;;  %1336 = vmatpush3.bf16.msra.mxu0 %v1333_v13  ;;  %1361 = vmatpush3.bf16.msra.mxu1 %v1333_v13 }
 0x258   : > { %v1337_v16 = vpack.c.bf16 %v1190_v14, %v641_v15 }
 0x25a   : > { %v1193_v17 = vpop.f32.mrb[12].mxu1  ;;  %1338 = vmatprep.subr.bf16.mxu0 %v1337_v16  ;;  %1354 = vmatprep.subr.bf16.mxu1 %v1337_v16 }
 0x25b   : > { %v651_v18 = vpop.f32.mrb[13].mxu1  ;;  %1340 = vmatpush3.bf16.msra.mxu0 %v1337_v16  ;;  %1362 = vmatpush3.bf16.msra.mxu1 %v1337_v16 }
 0x25c   : > { %v1341_v19 = vpack.c.bf16 %v1193_v17, %v651_v18 }
 0x25e   : > { %v1196_v20 = vpop.f32.mrb[14].mxu1  ;;  %1342 = vmatprep.subr.bf16.mxu0 %v1341_v19  ;;  %1355 = vmatprep.subr.bf16.mxu1 %v1341_v19 }
 0x25f   : > { %v661_v21 = vpop.f32.mrb[15].mxu1  ;;  %1344 = vmatpush3.bf16.msra.mxu0 %v1341_v19  ;;  %1363 = vmatpush3.bf16.msra.mxu1 %v1341_v19 }
 0x260   : > { %v1345_v22 = vpack.c.bf16 %v1196_v20, %v661_v21 }
 0x262   : > { %1346 = vmatprep.subr.bf16.mxu0 %v1345_v22  ;;  %1356 = vmatprep.subr.bf16.mxu1 %v1345_v22 }
 0x263   : > { %1348 = vmatpush3.bf16.msra.mxu0 %v1345_v22  ;;  %1364 = vmatpush3.bf16.msra.mxu1 %v1345_v22 }
 0x266   : > { %1230 = vmatmul.mubr.f32.vlgmr.msra.gmra.mrb[16].mxu0 %v1866_v45  ;;  %1242 = vmatmul.mubr.f32.vlgmr.msra.gmra.mrb[16].mxu1 %v1898_v54  ;;  %v980_v45 = vld [vmem:[%s308_s11] ss:$0 sm:$0xff] }
 0x267   : > { %1232 = vmatprep.mubr.f32.mxu0 %v1869_v47  ;;  %1244 = vmatprep.mubr.f32.mxu1 %v1901_v55 }
 0x26a   : > { %1233 = vmatmul.mubr.f32.gmra.mrb[18].mxu0 %v1874_v48  ;;  %1245 = vmatmul.mubr.f32.gmra.mrb[18].mxu1 %v1906_v56 }
 0x26b   : > { %1235 = vmatprep.mubr.f32.mxu0 %v1877_v49  ;;  %1247 = vmatprep.mubr.f32.mxu1 %v1909_v57 }
 0x26e   : > { %1236 = vmatmul.mubr.f32.gmra.mrb[20].mxu0 %v1882_v50  ;;  %1248 = vmatmul.mubr.f32.gmra.mrb[20].mxu1 %v1914_v58 }
 0x26f   : > { %1238 = vmatprep.mubr.f32.mxu0 %v1885_v51  ;;  %1250 = vmatprep.mubr.f32.mxu1 %v1917_v59 }
 0x272   : > { %1239 = vmatmul.mubr.f32.gmra.mrb[22].mxu0 %v1890_v52  ;;  %1251 = vmatmul.mubr.f32.gmra.mrb[22].mxu1 %v1922_v60 }
 0x339   : > { %v1231_v47 = vpop.f32.mrb[16].mxu0  ;;  %v1243_v48 = vpop.f32.mrb[16].mxu1 }
 0x33a   : > { %v749_v49 = vadd.f32 %v1231_v47, %v980_v45  ;;  %v789_v50 = vadd.f32 %v1243_v48, %v980_v45  ;;  %v743_v54 = vpop.f32.mrb[17].mxu0  ;;  %v783_v51 = vpop.f32.mrb[17].mxu1 }
 0x33b   : > { %v744_v55 = vadd.f32 %v980_v45, %v743_v54  ;;  %v784_v56 = vadd.f32 %v980_v45, %v783_v51 }
 0x33c   : > { %823 = vst [vmem:[%s1952_s12 + $0x8] sm:$0xff] %v749_v49  ;;  %831 = vst [vmem:[%s1952_s12 + $0x48] sm:$0xff] %v789_v50 }
 0x33d   : > { %822 = vst [vmem:[%s1952_s12] sm:$0xff] %v744_v55  ;;  %830 = vst [vmem:[%s1952_s12 + $0x40] sm:$0xff] %v784_v56  ;;  %v1234_v52 = vpop.f32.mrb[18].mxu0  ;;  %v1246_v57 = vpop.f32.mrb[18].mxu1 }
 0x33e   : > { %v759_v58 = vadd.f32 %v1234_v52, %v980_v45  ;;  %v799_v59 = vadd.f32 %v1246_v57, %v980_v45  ;;  %v753_v60 = vpop.f32.mrb[19].mxu0  ;;  %v793_v23 = vpop.f32.mrb[19].mxu1 }
 0x33f   : > { %v754_v24 = vadd.f32 %v980_v45, %v753_v60  ;;  %v794_v25 = vadd.f32 %v980_v45, %v793_v23 }
 0x340   : > { %825 = vst [vmem:[%s1952_s12 + $0x18] sm:$0xff] %v759_v58  ;;  %833 = vst [vmem:[%s1952_s12 + $0x58] sm:$0xff] %v799_v59 }
 0x341   : > { %824 = vst [vmem:[%s1952_s12 + $0x10] sm:$0xff] %v754_v24  ;;  %832 = vst [vmem:[%s1952_s12 + $0x50] sm:$0xff] %v794_v25  ;;  %v1237_v26 = vpop.f32.mrb[20].mxu0  ;;  %v1249_v27 = vpop.f32.mrb[20].mxu1 }
 0x342   : > { %v769_v28 = vadd.f32 %v1237_v26, %v980_v45  ;;  %v809_v29 = vadd.f32 %v1249_v27, %v980_v45  ;;  %v763_v30 = vpop.f32.mrb[21].mxu0  ;;  %v803_v31 = vpop.f32.mrb[21].mxu1 }
 0x343   : > { %v764_v32 = vadd.f32 %v980_v45, %v763_v30  ;;  %v804_v33 = vadd.f32 %v980_v45, %v803_v31 }
 0x344   : > { %827 = vst [vmem:[%s1952_s12 + $0x28] sm:$0xff] %v769_v28  ;;  %835 = vst [vmem:[%s1952_s12 + $0x68] sm:$0xff] %v809_v29 }
 0x345   : > { %826 = vst [vmem:[%s1952_s12 + $0x20] sm:$0xff] %v764_v32  ;;  %834 = vst [vmem:[%s1952_s12 + $0x60] sm:$0xff] %v804_v33  ;;  %v1240_v34 = vpop.f32.mrb[22].mxu0  ;;  %v1252_v35 = vpop.f32.mrb[22].mxu1 }
 0x346   : > { %v779_v36 = vadd.f32 %v1240_v34, %v980_v45  ;;  %v819_v37 = vadd.f32 %v1252_v35, %v980_v45  ;;  %v773_v38 = vpop.f32.mrb[23].mxu0  ;;  %v813_v39 = vpop.f32.mrb[23].mxu1 }
 0x347   : > { %v774_v40 = vadd.f32 %v980_v45, %v773_v38  ;;  %v814_v41 = vadd.f32 %v980_v45, %v813_v39 }
 0x348   : > { %829 = vst [vmem:[%s1952_s12 + $0x38] sm:$0xff] %v779_v36  ;;  %837 = vst [vmem:[%s1952_s12 + $0x78] sm:$0xff] %v819_v37 }
 0x349   : > { %828 = vst [vmem:[%s1952_s12 + $0x30] sm:$0xff] %v774_v40  ;;  %836 = vst [vmem:[%s1952_s12 + $0x70] sm:$0xff] %v814_v41 }
 0x34a   : > { %1532 = shalt.err (!%p1529_p8)
}
 0x34b   : > { %s1533_s10 = scalar_lea.hbm %s1971_s13, 2048  ;;  %s1537_s26 = scalar_lea.hbm %s2028_s5, 4096 }
 0x34c   : > { %p1534_p7 = scmp.ne.s32.totalorder %s1971_s13, %s1533_s10  ;;  %p1538_p9 = scmp.lt.u32.totalorder %s1971_s13, %s2028_s5 }
 0x34d   : > { %p1539_p12 = scmp.lt.u32.totalorder %s1537_s26, %s1533_s10  ;;  %p1541_p1 = scmp.lt.u32.totalorder %s1533_s10, %s1971_s13 }
 0x34e   : > { %p1535_p3 = pnand %p1534_p7, %p2045_p11 }
 0x34f   : > { %p1540_p6 = por %p1539_p12, %p1538_p9 }
 0x350   : > { %p1536_p0 = pneg %p1535_p3 }
 0x351   : > { %p1542_p13 = por %p1541_p1, %p1540_p6 }
 0x353   : > { %p1543_p4 = pnand %p1542_p13, %p1536_p0 }
 0x355   : > { %1546 = shalt.err (!%p1543_p4)
}
 0x356   : > { %s1601_s12 = smov 128   ;;  %s1602_s17 = smov 8  }
 0x357   : > { %1373 = dma.vmem_to_hbm [thread:$0]  (%p2045_p11), %s1973_s8, 2048, %s1971_s13, %s1981_s16, %s1601_s12, %s1601_s12, %s1602_s17  }
 0x358 PF: > { %s867_s9 = sand.u32 1, %s1581_s18   ;;  %p2046_p2 = scmp.ne.s32.totalorder %s2036_s7, 0 }
 0x359   : > { %p2047_p5 = scmp.ge.s32.totalorder %s1593_s21, 2  ;;  %s868_s14 = scalar_lea.sflag [#allocation4], %s867_s9 }
 0x35b   : > { %p1387_p10 = pnand %p2047_p5, %p2046_p2 }
 0x35d   : > { %1576 = dma.done.wait (!%p1387_p10), %s868_s14, 2048  }
 0x35e   : > { %1578 = vsyncadd (!%p1387_p10), %s868_s14, 4294965248  ;;  %p19_p8 = scmp.ge.s32.totalorder %s1654_s22, 4   ;;  %s2048_s18 = smov %s1585_s19 }
 0x35f   : > { %s2049_s19 = smov %s1589_s20  ;;  %s2050_s20 = smov %s1663_s25 }
 0x360   : > { %s2051_s21 = smov %s1654_s22  ;;  %21 = sbr.rel (!%p19_p8) target bundleno = 6 (0x6), region = 103 }
 0x367   :  { %873 = vsyncpa [#allocation3], 1 }
 0x368   :  { %875 = vsyncpa [#allocation3 + $0x1], 1 }
 0x369   :  { %876 = vsyncpa [#allocation6], 1 }
 0x36a   :  { %877 = vsyncpa [#allocation4], 1 }
 0x36b   :  { %879 = vsyncpa [#allocation4 + $0x1], 1 }

</bundles_post_ra>
